<compile_context>
chip_gen: v7x
topology: tpu7x:2x2x1
jax: 0.10.0
libtpu: 0.0.40
codegen_flags: <defaults>
</compile_context>

<pallas_src>
import functools
import math

import jax
import jax.numpy as jnp
from jax import lax
from jax.experimental import pallas as pl
from jax.experimental.pallas import tpu as pltpu

START_TAG = "<START>"
STOP_TAG = "<STOP>"
NEG_INF = -10000.0  # same sentinel the torch module uses


# -----------------------------------------------------------------------------
# Kernel 1: fused LockedDropout + nn.Linear(n_hid, n_out, bias=False)
# -----------------------------------------------------------------------------
def _locked_dropout_linear_kernel(x_ref, mask_ref, w_ref, o_ref):
    # x_ref:    (tr, n_hid)   bf16 row-tile of the flattened (seq*bs, n_hid) activations
    # mask_ref: (tr, n_hid)   f32  locked-dropout mask tile (scaled by 1/(1-p)); the
    #                              row->batch mapping repeats every bs rows, so one resident
    #                              tile serves every grid step.
    # w_ref:    (n_out, n_hid) bf16 torch nn.Linear layout, resident across the grid
    # o_ref:    (tr, n_out)   f32
    y = (x_ref[...].astype(jnp.float32) * mask_ref[...]).astype(jnp.bfloat16)  # f32 VPU mul (v5e-safe)
    out = lax.dot_general(                              # y @ W^T without materializing W^T
        y, w_ref[...],                                  # bf16 MXU operands ...
        dimension_numbers=(((1,), (1,)), ((), ())),
        preferred_element_type=jnp.float32)             # ... with f32 accumulation
    o_ref[...] = out.astype(o_ref.dtype)


def _pick_row_tile(n_rows, bs, block_rows):
    """Row tile: multiple of lcm(bs, 16) (mask period & bf16 sublane pack), divides n_rows,
    and leaves >= 2 grid steps when possible so the parallel axis shards over v7x's 2 TCs."""
    unit = bs * 16 // math.gcd(bs, 16)
    assert n_rows % unit == 0, (
        "demo wrapper keeps tiling simple: seq*bs must be a multiple of lcm(bs, 16)")
    tr = max(unit, min(block_rows, n_rows) // unit * unit)
    while n_rows % tr:
        tr -= unit
    if n_rows // tr < 2 and n_rows >= 2 * unit:
        tr = (n_rows // 2) // unit * unit
        while n_rows % tr:
            tr -= unit
    return tr


def locked_dropout_linear(x, mask, w, *, block_rows=1024):
    """x: (seq, bs, n_hid) = outputs[-1]; mask: (bs, n_hid) f32; w: (n_out, n_hid).

    Returns feats of shape (seq*bs, n_out), same row order as torch's
    decoder(dropout(outputs[-1]).view(seq*bs, n_hid)).view(-1, n_out).
    """
    seq, bs, n_hid = x.shape
    n_out = w.shape[0]
    n_rows = seq * bs
    tr = _pick_row_tile(n_rows, bs, block_rows)

    x2 = x.reshape(n_rows, n_hid)                 # free reshape; row r <-> batch index r % bs
    if x2.dtype != jnp.bfloat16:
        x2 = x2.astype(jnp.bfloat16)              # halve the dominant HBM read (mem-bound kernel)
    # Deliberate choice: compute-weight precision is bf16 (f32 master copy kept by the caller).
    w_bf16 = w.astype(jnp.bfloat16)
    mask_tile = jnp.tile(mask.astype(jnp.float32), (tr // bs, 1))   # one VMEM-resident tile

    # VMEM footprint: double-buffered bf16 x tile + single-buffered mask/weights + f32 out.
    vmem_budget = (2 * tr * n_hid * 2 + tr * n_hid * 4
                   + n_out * n_hid * 2 + 2 * tr * n_out * 4)
    vmem_limit = int(min(max(2 * vmem_budget, 4 << 20), 48 << 20))  # cap for v7x's 64 MiB VMEM

    out_shape = jax.ShapeDtypeStruct((n_rows, n_out), jnp.float32)
    params = pltpu.CompilerParams(
        dimension_semantics=("parallel",),   # independent row tiles -> shard over v7x's 2 TCs
        vmem_limit_bytes=vmem_limit)

    def run(resident_mode):
        def resident(shape):
            if resident_mode is None:
                return pl.BlockSpec(shape, lambda i: (0, 0))
            return pl.BlockSpec(shape, lambda i: (0, 0), pipeline_mode=resident_mode)
        return pl.pallas_call(
            _locked_dropout_linear_kernel,
            out_shape=out_shape,
            grid=(n_rows // tr,),
            in_specs=[
                pl.BlockSpec((tr, n_hid), lambda i: (i, 0)),  # activation tile (pipelined)
                resident((tr, n_hid)),                        # locked mask tile (resident)
                resident((n_out, n_hid)),                     # weights (resident, bf16)
            ],
            out_specs=pl.BlockSpec((tr, n_out), lambda i: (i, 0)),
            compiler_params=params,
        )(x2, mask_tile, w_bf16)

    try:
        # Grid-invariant operands don't need double buffers; Buffered(1) frees their 2nd copy.
        return run(pl.Buffered(1))
    except Exception:  # noqa: BLE001  - jax builds without Buffered(1) pipeline support
        return run(None)


# -----------------------------------------------------------------------------
# Kernel 2: CRF forward algorithm (log-partition), whole recursion in one kernel
# -----------------------------------------------------------------------------
def _crf_forward_kernel(feats_ref, exp_trans_t_ref, tmax_ref, stop_row_ref, alpha_ref,
                        *, start_idx, unroll):
    # feats_ref:       (n_steps, 1, T) f32  all emissions, VMEM-resident
    # exp_trans_t_ref: (T, T) f32  exp(transitions - rowmax)^T (prev on sublanes, next on lanes)
    # tmax_ref:        (1, T) f32  per-next-tag row max of transitions (log-domain shift)
    # stop_row_ref:    (1, T) f32  transitions[STOP, :]
    # alpha_ref:       (1, 1) f32  output log-partition
    n_steps = feats_ref.shape[0]
    n_tags = feats_ref.shape[-1]

    exp_t = exp_trans_t_ref[...]                        # hoisted out of the loop
    tmax = tmax_ref[...]

    lane = lax.broadcasted_iota(jnp.int32, (1, n_tags), 1)
    fv0 = jnp.where(lane == start_idx, 0.0, NEG_INF).astype(jnp.float32)

    def body(t, fv):
        feat = feats_ref[t]                             # (1, T), dynamic leading-axis index
        m = jnp.max(fv, axis=-1, keepdims=True)         # (1, 1)
        a = jnp.exp(fv - m)                             # (1, T), args <= 0
        # logsumexp over previous tags for every next tag, kept lane-major via a tiny matmul:
        #   s[0, j] = sum_i exp(fv[i] - m) * exp(transitions[j, i] - tmax[j])
        s = jnp.dot(a, exp_t, preferred_element_type=jnp.float32)          # (1, T)
        return feat + m + tmax + jnp.log(s)             # exact torch recursion, no exp overflow

    fv = lax.fori_loop(0, n_steps, body, fv0, unroll=unroll)

    tv = fv + stop_row_ref[...]                         # + transitions[STOP, :]
    m2 = jnp.max(tv, axis=-1, keepdims=True)
    alpha_ref[...] = m2 + jnp.log(jnp.sum(jnp.exp(tv - m2), axis=-1, keepdims=True))


def crf_forward_alpha(feats, transitions, *, start_idx, stop_idx, unroll=8):
    """feats: (n_steps, T) f32; transitions[next, prev]: (T, T) f32. Returns scalar alpha."""
    n_steps, n_tags = feats.shape
    feats3 = feats.reshape(n_steps, 1, n_tags)          # free reshape; per-step (1, T) rows
    # Shift each row of transitions by its max so every exp() argument is <= 0 (overflow-safe
    # even for large learned transitions); the shift is added back in log-domain per step.
    tmax = jnp.max(transitions, axis=1, keepdims=True)          # (T, 1)
    exp_trans_t = jnp.exp(transitions - tmax).T                  # (T_prev, T_next), all <= 1
    tmax_row = tmax.reshape(1, n_tags)
    stop_row = transitions[stop_idx].reshape(1, n_tags)

    alpha = pl.pallas_call(
        functools.partial(_crf_forward_kernel, start_idx=start_idx,
                          unroll=max(1, min(unroll, n_steps))),
        out_shape=jax.ShapeDtypeStruct((1, 1), jnp.float32),
    )(feats3, exp_trans_t, tmax_row, stop_row)
    return alpha[0, 0]


# -----------------------------------------------------------------------------
# Plain-JAX glue: gold-path score and the module-level forward
# -----------------------------------------------------------------------------
def crf_score_sentence(feats, tags, transitions, *, start_idx, stop_idx):
    """_score_sentence: a handful of scalar gathers -- no vector work worth a kernel."""
    n = feats.shape[0]
    tags = tags.astype(jnp.int32)
    prev = jnp.concatenate([jnp.asarray([start_idx], jnp.int32), tags[:-1]])
    emit = feats[jnp.arange(n), tags]
    trans = transitions[tags, prev]
    return jnp.sum(emit) + jnp.sum(trans) + transitions[stop_idx, tags[-1]]


def linear_decoder_forward(inputs, dropout_mask, weight, transitions, *,
                           start_idx, stop_idx, block_rows=1024):
    """Mirrors LinearDecoder.forward for the training branch (len(tags) > 0)."""
    _, outputs, tags = inputs
    feats = locked_dropout_linear(outputs[-1], dropout_mask, weight, block_rows=block_rows)
    if tags is None or tags.shape[0] == 0:
        # TODO(synk): _viterbi_decode (inference-only branch, data-dependent backtracking)
        # is not ported to Pallas.
        raise NotImplementedError("viterbi decode path not implemented")
    forward_score = crf_forward_alpha(feats, transitions,
                                      start_idx=start_idx, stop_idx=stop_idx)
    gold_score = crf_score_sentence(feats, tags, transitions,
                                    start_idx=start_idx, stop_idx=stop_idx)
    return forward_score - gold_score


# -----------------------------------------------------------------------------
# Demo / correctness check
# -----------------------------------------------------------------------------
if __name__ == "__main__":
    SEQ, BS, N_HID = 16, 2, 128          # n_hid lane-dense (multiple of 128)
    TAGSET = 8                           # n_out == tagset_size (incl. <START>/<STOP>)
    DROP_P = 0.25

    tag_to_idx = {f"TAG{i}": i for i in range(TAGSET - 2)}
    tag_to_idx[START_TAG] = TAGSET - 2
    tag_to_idx[STOP_TAG] = TAGSET - 1
    start_idx, stop_idx = tag_to_idx[START_TAG], tag_to_idx[STOP_TAG]

    key = jax.random.PRNGKey(0)
    kx, kw, kt, km, ktag = jax.random.split(key, 5)

    # outputs[-1]: last RNN-layer output in torch layout (seq, bs, n_hid).
    h = jax.random.normal(kx, (SEQ, BS, N_HID), jnp.float32)
    outputs = [h]
    # Gold tags over the flattened (seq*bs) rows, as LinearDecoder.forward consumes them.
    tags = jax.random.randint(ktag, (SEQ * BS,), 0, start_idx, dtype=jnp.int32)

    # decoder = nn.Linear(n_hid, n_out, bias=False), weight ~ U(-0.1, 0.1); f32 master copy.
    w = jax.random.uniform(kw, (TAGSET, N_HID), jnp.float32, -0.1, 0.1)

    # CRF transitions[next, prev] = randn, with row <START> and column <STOP> blocked.
    transitions = jax.random.normal(kt, (TAGSET, TAGSET), jnp.float32)
    transitions = transitions.at[start_idx, :].set(NEG_INF)
    transitions = transitions.at[:, stop_idx].set(NEG_INF)

    # LockedDropout: one (bs, n_hid) Bernoulli(1-p)/(1-p) mask per call, shared over seq.
    # (Sampled with jax.random in the wrapper; torch's exact RNG bit-stream is not reproducible.)
    keep = jax.random.bernoulli(km, 1.0 - DROP_P, (BS, N_HID))
    mask = keep.astype(jnp.float32) / (1.0 - DROP_P)

    loss = linear_decoder_forward((None, outputs, tags), mask, w, transitions,
                                  start_idx=start_idx, stop_idx=stop_idx)
    loss = jax.block_until_ready(loss)

    # ---- reference check (pure JAX, same bf16-matmul semantics, exact torch-style CRF) ----
    feats_k = jax.block_until_ready(locked_dropout_linear(h, mask, w))
    w_bf16 = w.astype(jnp.bfloat16)
    y_ref = (h.astype(jnp.bfloat16).astype(jnp.float32) * mask[None]
             ).astype(jnp.bfloat16).reshape(SEQ * BS, N_HID)
    feats_ref = lax.dot_general(y_ref, w_bf16, (((1,), (1,)), ((), ())),
                                preferred_element_type=jnp.float32)
    assert bool(jnp.allclose(feats_k, feats_ref, atol=2e-2, rtol=2e-2)), "feats mismatch"

    def _ref_forward_alg(feats, trans):              # exact torch-style recursion
        fv0 = jnp.full((TAGSET,), NEG_INF, jnp.float32).at[start_idx].set(0.0)

        def step(fv, feat):
            sc = fv[None, :] + trans + feat[:, None]
            m = sc.max(axis=1)
            return m + jnp.log(jnp.sum(jnp.exp(sc - m[:, None]), axis=1)), None

        fv, _ = lax.scan(step, fv0, feats)
        tv = fv + trans[stop_idx]
        m = tv.max()
        return m + jnp.log(jnp.sum(jnp.exp(tv - m)))

    loss_ref = (_ref_forward_alg(feats_ref, transitions)
                - crf_score_sentence(feats_ref, tags, transitions,
                                     start_idx=start_idx, stop_idx=stop_idx))
    assert bool(jnp.allclose(loss, loss_ref, atol=1e-1, rtol=2e-2)), (loss, loss_ref)

    print("KERNEL_OK")
</pallas_src>

<mosaic_0001>
module attributes {stable_mosaic.version = 11 : i64} {
  func.func @_locked_dropout_linear_kernel(%arg0: i32, %arg1: memref<16x128xbf16, #tpu.memory_space<vmem>>, %arg2: memref<16x128xf32, #tpu.memory_space<vmem>>, %arg3: memref<8x128xbf16, #tpu.memory_space<vmem>>, %arg4: memref<16x8xf32, #tpu.memory_space<vmem>>) attributes {dimension_semantics = [#tpu.dimension_semantics<parallel>], iteration_bounds = array<i64: 2>, scalar_prefetch = 0 : i64, scratch_operands = 0 : i64, tpu.core_type = #tpu.core_type<tc>, window_params = [{transform_indices = @transform_0, window_bounds = array<i64: 16, 128>}, {pipeline_mode = #tpu.pipeline_mode<synchronous>, transform_indices = @transform_1, window_bounds = array<i64: 16, 128>}, {pipeline_mode = #tpu.pipeline_mode<synchronous>, transform_indices = @transform_2, window_bounds = array<i64: 8, 128>}, {transform_indices = @transform_3, window_bounds = array<i64: 16, 8>}]} {
    %c0 = arith.constant 0 : index
    %c0_0 = arith.constant 0 : index
    %0 = vector.load %arg1[%c0, %c0_0] : memref<16x128xbf16, #tpu.memory_space<vmem>>, vector<16x128xbf16>
    %1 = arith.extf %0 : vector<16x128xbf16> to vector<16x128xf32>
    %c0_1 = arith.constant 0 : index
    %c0_2 = arith.constant 0 : index
    %2 = vector.load %arg2[%c0_1, %c0_2] : memref<16x128xf32, #tpu.memory_space<vmem>>, vector<16x128xf32>
    %3 = arith.mulf %1, %2 : vector<16x128xf32>
    %4 = arith.truncf %3 : vector<16x128xf32> to vector<16x128xbf16>
    %c0_3 = arith.constant 0 : index
    %c0_4 = arith.constant 0 : index
    %5 = vector.load %arg3[%c0_3, %c0_4] : memref<8x128xbf16, #tpu.memory_space<vmem>>, vector<8x128xbf16>
    %cst = arith.constant dense<0.000000e+00> : vector<16x8xf32>
    %6 = tpu.matmul %4, %5, %cst {dimension_numbers = #tpu.dot_dimension_numbers<[1], [1], [0], [0], [0, 0, 1, 0], [], []>} : vector<16x128xbf16>, vector<8x128xbf16>, vector<16x8xf32> -> vector<16x8xf32>
    %c0_5 = arith.constant 0 : index
    %c0_6 = arith.constant 0 : index
    %7 = vector.load %arg4[%c0_5, %c0_6] : memref<16x8xf32, #tpu.memory_space<vmem>>, vector<16x8xf32>
    tpu.vector_store %arg4[%c0_5, %c0_6], %6 {strides = array<i32>} : memref<16x8xf32, #tpu.memory_space<vmem>>, vector<16x8xf32>,
    return
  }
  func.func @transform_0(%arg0: i32) -> (i32, i32) {
    %c0_i32 = arith.constant 0 : i32
    %c0_i32_0 = arith.constant 0 : i32
    return %arg0, %c0_i32 : i32, i32
  }
  func.func @transform_1(%arg0: i32) -> (i32, i32) {
    %c0_i32 = arith.constant 0 : i32
    %c0_i32_0 = arith.constant 0 : i32
    %c0_i32_1 = arith.constant 0 : i32
    return %c0_i32, %c0_i32_0 : i32, i32
  }
  func.func @transform_2(%arg0: i32) -> (i32, i32) {
    %c0_i32 = arith.constant 0 : i32
    %c0_i32_0 = arith.constant 0 : i32
    %c0_i32_1 = arith.constant 0 : i32
    return %c0_i32, %c0_i32_0 : i32, i32
  }
  func.func @transform_3(%arg0: i32) -> (i32, i32) {
    %c0_i32 = arith.constant 0 : i32
    %c0_i32_0 = arith.constant 0 : i32
    return %arg0, %c0_i32 : i32, i32
  }
}

module attributes {stable_mosaic.version = 11 : i64} {
  func.func @_locked_dropout_linear_kernel(%arg0: i32, %arg1: memref<16x128xbf16, #tpu.memory_space<vmem>>, %arg2: memref<16x128xf32, #tpu.memory_space<vmem>>, %arg3: memref<8x128xbf16, #tpu.memory_space<vmem>>, %arg4: memref<16x8xf32, #tpu.memory_space<vmem>>) attributes {dimension_semantics = [#tpu.dimension_semantics<parallel>], iteration_bounds = array<i64: 2>, scalar_prefetch = 0 : i64, scratch_operands = 0 : i64, tpu.core_type = #tpu.core_type<tc>, window_params = [{transform_indices = @transform_0, window_bounds = array<i64: 16, 128>}, {pipeline_mode = #tpu.pipeline_mode<synchronous>, transform_indices = @transform_1, window_bounds = array<i64: 16, 128>}, {pipeline_mode = #tpu.pipeline_mode<synchronous>, transform_indices = @transform_2, window_bounds = array<i64: 8, 128>}, {transform_indices = @transform_3, window_bounds = array<i64: 16, 8>}]} {
    %c0 = arith.constant 0 : index
    %c0_0 = arith.constant 0 : index
    %0 = vector.load %arg1[%c0, %c0_0] : memref<16x128xbf16, #tpu.memory_space<vmem>>, vector<16x128xbf16>
    %1 = arith.extf %0 : vector<16x128xbf16> to vector<16x128xf32>
    %c0_1 = arith.constant 0 : index
    %c0_2 = arith.constant 0 : index
    %2 = vector.load %arg2[%c0_1, %c0_2] : memref<16x128xf32, #tpu.memory_space<vmem>>, vector<16x128xf32>
    %3 = arith.mulf %1, %2 : vector<16x128xf32>
    %4 = arith.truncf %3 : vector<16x128xf32> to vector<16x128xbf16>
    %c0_3 = arith.constant 0 : index
    %c0_4 = arith.constant 0 : index
    %5 = vector.load %arg3[%c0_3, %c0_4] : memref<8x128xbf16, #tpu.memory_space<vmem>>, vector<8x128xbf16>
    %cst = arith.constant dense<0.000000e+00> : vector<16x8xf32>
    %6 = tpu.matmul %4, %5, %cst {dimension_numbers = #tpu.dot_dimension_numbers<[1], [1], [0], [0], [0, 0, 1, 0], [], []>} : vector<16x128xbf16>, vector<8x128xbf16>, vector<16x8xf32> -> vector<16x8xf32>
    %c0_5 = arith.constant 0 : index
    %c0_6 = arith.constant 0 : index
    %7 = vector.load %arg4[%c0_5, %c0_6] : memref<16x8xf32, #tpu.memory_space<vmem>>, vector<16x8xf32>
    tpu.vector_store %arg4[%c0_5, %c0_6], %6 {strides = array<i32>} : memref<16x8xf32, #tpu.memory_space<vmem>>, vector<16x8xf32>,
    return
  }
  func.func @transform_0(%arg0: i32) -> (i32, i32) {
    %c0_i32 = arith.constant 0 : i32
    %c0_i32_0 = arith.constant 0 : i32
    return %arg0, %c0_i32 : i32, i32
  }
  func.func @transform_1(%arg0: i32) -> (i32, i32) {
    %c0_i32 = arith.constant 0 : i32
    %c0_i32_0 = arith.constant 0 : i32
    %c0_i32_1 = arith.constant 0 : i32
    return %c0_i32, %c0_i32_0 : i32, i32
  }
  func.func @transform_2(%arg0: i32) -> (i32, i32) {
    %c0_i32 = arith.constant 0 : i32
    %c0_i32_0 = arith.constant 0 : i32
    %c0_i32_1 = arith.constant 0 : i32
    return %c0_i32, %c0_i32_0 : i32, i32
  }
  func.func @transform_3(%arg0: i32) -> (i32, i32) {
    %c0_i32 = arith.constant 0 : i32
    %c0_i32_0 = arith.constant 0 : i32
    return %arg0, %c0_i32 : i32, i32
  }
}

</mosaic_0001>

<bundles_post_ra>
// kernel: tpu_custom_call.1
= control target key start
LH: loop header
LB: loop body
LE: loop exit
PB: predicated region body
PF: predicated region fallthrough
CT: control target
= control target key end

     0   :  { %8 = vsyncpa [#allocation3], 0  ;;  %s698_s0 = inlined_call_operand.hbm [shape: bf16[32,128], index: 0, kind: input, shape index: {}]   ;;  %s699_s1 = inlined_call_operand.hbm [shape: f32[16,128], index: 1, kind: input, shape index: {}]   ;;  %s700_s2 = inlined_call_operand.vmem [shape: bf16[8,128], index: 2, kind: input, shape index: {}]   ;;  %s701_s3 = inlined_call_operand.vmem [shape: f32[32,8], index: 3, kind: output, shape index: {}]  }
   0x1   :  { %10 = vsyncpa [#allocation3 + $0x1], 0 }
   0x2   :  { %11 = vsyncpa [#allocation5], 0  ;;  %s550_s12 = smov 0   ;;  %s552_s13 = smov 0  }
   0x3   :  { %s554_s14 = smov 0   ;;  %s556_s15 = smov 0  }
   0x4 LB: > { %s340_s16 = sadd.s32 4294967295, %s520_s15   ;;  %p37_p0 = scmp.ne.s32.totalorder %s512_s13, %s508_s12  ;;  %s520_s15 = sphi %s556_s15, %s717_s15   ;;  %s516_s14 = sphi %s554_s14, %s716_s14   ;;  %s512_s13 = sphi %s552_s13, %s715_s13   ;;  %s508_s12 = sphi %s550_s12, %s714_s12  }
   0x5   : > { %p572_p1 = scmp.eq.s32.totalorder %s340_s16, 0  ;;  %p342_p2 = scmp.ge.s32.totalorder %s520_s15, 1 }
   0x6   : > { %p116_p3 = scmp.lt.s32.totalorder %s520_s15, 3  ;;  %s522_s20 = smov [#allocation4]  }
   0x7   : > { %s706_s17 = scalar_select %p572_p1, 1, 0 }
   0x8   : > { %p580_p4 = por %p572_p1, %p37_p0  ;;  %p584_p5 = pnand %p342_p2, %p116_p3 }
   0x9   : > { %s128_s21 = sshll.u32 %s522_s20, 4  ;;  %s597_s23 = sadd.s32 1, %s520_s15   ;;  %s129_s21 = int_to_ptr.vmem [resolvable:$true] %s128_s21 }
   0xa   : > { %s707_s18 = scalar_select %p580_p4, 1, 0 }
   0xb   : > { %s708_s19 = scalar_select %p584_p5, 1, 0 }
   0xc   : > { %p374_p6 = pneg %p584_p5  ;;  %s24_s24 = sadd.s32 1, %s516_s14 }
   0xd   : > { %s21_s25 = ssub.s32 %s520_s15, %s597_s23  ;;  %s424_s28 = scalar_lea.hbm %s699_s1, 256 }
   0xe   : > { %p592_p7 = pnand %p374_p6, %p572_p1  ;;  %p425_p8 = scmp.ne.s32.totalorder %s699_s1, %s424_s28 }
   0xf   : > { %p431_p12 = scmp.lt.u32.totalorder %s424_s28, %s699_s1 }
  0x10   : > { %p426_p9 = pneg %p592_p7 }
  0x12   : > { %p427_p10 = pnand %p426_p9, %p425_p8 }
  0x14   : > { %p428_p11 = pneg %p427_p10 }
  0x16   : > { %p433_p13 = pnand %p431_p12, %p428_p11 }
  0x18   : > { %436 = shalt.err (!%p433_p13)
}
  0x19   : > { %s437_s6 = scalar_lea.vmem %s129_s21, 256  ;;  %p445_p6 = scmp.lt.s32.totalorder %s129_s21, %s129_s21 }
  0x1a   : > { %p438_p0 = scmp.ne.s32.totalorder %s129_s21, %s437_s6  ;;  %p446_p1 = scmp.lt.s32.totalorder %s437_s6, %s437_s6 }
  0x1c   : > { %p440_p2 = pnand %p438_p0, %p426_p9  ;;  %p447_p4 = por %p446_p1, %p445_p6 }
  0x1e   : > { %p441_p3 = pneg %p440_p2 }
  0x20   : > { %p448_p5 = pnand %p447_p4, %p441_p3 }
  0x22   : > { %451 = shalt.err (!%p448_p5)
}
  0x23   : > { %s523_s7 = smov 128   ;;  %s524_s8 = smov 8  }
  0x24   : > { %377 = dma.hbm_to_vmem [thread:$0]  (!%p592_p7), %s699_s1, 256, %s129_s21, [#allocation5], %s523_s7, %s523_s7, %s524_s8  }
  0x25   : > { %p22_p8 = scmp.eq.s32.totalorder %s21_s25, 0  ;;  %p31_p9 = scmp.ne.s32.totalorder %s516_s14, %s512_s13 }
  0x26   : > { %p32_p1 = scmp.eq.s32.totalorder %s520_s15, 0  ;;  %p383_p4 = scmp.lt.s32.totalorder %s520_s15, 2 }
  0x27   : > { %s623_s11 = scalar_select %p22_p8, %s516_s14, %s24_s24  }
  0x28   : > { %p33_p5 = por %p32_p1, %p31_p9  ;;  %s145_s12 = sand.u32 1, %s516_s14  }
  0x29   : > { %s345_s20 = sshll.u32 %s145_s12, 3  ;;  %s355_s26 = sshll.u32 %s520_s15, 7 }
  0x2a   : > { %s630_s29 = scalar_lea.hbm %s698_s0, %s355_s26  ;;  %s149_s21 = scalar_lea.vmem [#allocation2], %s345_s20 }
  0x2b   : > { %s156_s22 = sshll.u32 %s149_s21, 4  ;;  %p634_p7 = pnand %p383_p4, %p33_p5  ;;  %s632_s22 = int_to_ptr.vmem [resolvable:$true] %s156_s22 }
  0x2c   : > { %s638_s25 = scalar_lea.sflag [#allocation3], %s145_s12  ;;  %s452_s30 = scalar_lea.hbm %s630_s29, 128 }
  0x2d   : > { %p453_p10 = scmp.ne.s32.totalorder %s630_s29, %s452_s30  ;;  %p454_p11 = pneg %p634_p7 }
  0x2e   : > { %s457_s6 = scalar_lea.hbm %s698_s0, 256  ;;  %p458_p0 = scmp.lt.u32.totalorder %s630_s29, %s698_s0 }
  0x2f   : > { %p455_p12 = pnand %p454_p11, %p453_p10  ;;  %p459_p2 = scmp.lt.u32.totalorder %s457_s6, %s452_s30 }
  0x30   : > { %p461_p6 = scmp.lt.u32.totalorder %s452_s30, %s630_s29 }
  0x31   : > { %p456_p13 = pneg %p455_p12  ;;  %p460_p3 = por %p459_p2, %p458_p0 }
  0x33   : > { %p462_p8 = por %p461_p6, %p460_p3 }
  0x35   : > { %p463_p9 = pnand %p462_p8, %p456_p13 }
  0x37   : > { %466 = shalt.err (!%p463_p9)
}
  0x38   : > { %s467_s9 = scalar_lea.vmem %s632_s22, 128  ;;  %s525_s10 = smov [#allocation2]  }
  0x39   : > { %p468_p1 = scmp.ne.s32.totalorder %s632_s22, %s467_s9  ;;  %s472_s12 = sshll.u32 %s525_s10, 4  ;;  %s473_s12 = int_to_ptr.vmem [resolvable:$false] %s472_s12 }
  0x3a   : > { %s474_s20 = scalar_lea.vmem %s473_s12, 256  ;;  %p475_p10 = scmp.lt.s32.totalorder %s632_s22, %s473_s12 }
  0x3b   : > { %p470_p4 = pnand %p468_p1, %p454_p11  ;;  %p476_p12 = scmp.lt.s32.totalorder %s474_s20, %s467_s9 }
  0x3d   : > { %p471_p5 = pneg %p470_p4  ;;  %p477_p0 = por %p476_p12, %p475_p10 }
  0x3f   : > { %p478_p2 = pnand %p477_p0, %p471_p5 }
  0x41   : > { %481 = shalt.err (!%p478_p2)
}
  0x42   : > { %s526_s26 = smov 64   ;;  %s527_s27 = smov 4  }
  0x43   : > { %381 = dma.hbm_to_vmem [thread:$0]  (!%p634_p7), %s630_s29, 128, %s632_s22, %s638_s25, %s526_s26, %s526_s26, %s527_s27  }
  0x44   : > { %p711_p11 = scmp.ne.s32.totalorder %s708_s19, 0 }
  0x45   : > { %s170_s28 = sand.u32 (!%p711_p11), 1, %s512_s13   ;;  %p712_p13 = scmp.ne.s32.totalorder (!%p711_p11), %s707_s18, 0 }
  0x46   : > { %168 = sbr.rel (%p711_p11) target bundleno = 305 (0x131), region = 32  ;;  %s349_s21 = sshll.u32 (!%p711_p11), %s170_s28, 3 }
  0x47   : > { %s171_s30 = scalar_lea.sflag (!%p711_p11), [#allocation3], %s170_s28  ;;  %s174_s4 = scalar_lea.vmem (!%p711_p11), [#allocation2], %s349_s21 }
  0x4d   : > { %499 = dma.done.wait (%p712_p13), %s171_s30, 128  }
  0x4e   : > { %501 = vsyncadd (%p712_p13), %s171_s30, 4294967168  ;;  %p713_p3 = scmp.ne.s32.totalorder %s706_s17, 0 }
  0x50   : > { %503 = dma.done.wait (%p713_p3), [#allocation5], 256  }
  0x51   : > { %505 = vsyncadd (%p713_p3), [#allocation5], 4294967040  ;;  %v528_v0 = vmov 0.0   ;;  %vm529_vm0 = vmmov 0   ;;  %v218_v1 = vld [vmem:[%s700_s2] sm:$0xf] }
  0x52   : > { %362 = vmatprep.subr.bf16.mxu0 %v528_v0  ;;  %364 = vmatprep.mubr.msk.bf16.mxu0 %vm529_vm0, %v528_v0  ;;  %v357_v2 = vld [vmem:[%s174_s4] sm:$0xff]   ;;  %v213_v3 = vld [vmem:[#allocation4] sm:$0xff]  ;;  %v214_v6 = vld [vmem:[#allocation4 + $0x8] sm:$0xff]  ;;  %s351_s17 = sshll.u32 %s340_s16, 1  ;;  %vm260_vm1 = vcmask 64512  }
  0x53   : > { %363 = vmatpush3.bf16.xpose.msra.mxu0 %v218_v1  ;;  %v358_v4 = vunpack.c.l.bf16 %v357_v2  ;;  %v359_v5 = vunpack.c.h.bf16 %v357_v2  ;;  %p203_p7 = scmp.lt.s32.totalorder %s351_s17, 3 }
  0x55   : > { %v215_v7 = vmul.f32 %v358_v4, %v213_v3  ;;  %v216_v8 = vmul.f32 %v359_v5, %v214_v6  ;;  %s719_s17 = smov (!%p203_p7, %s351_s17), 3 }
  0x56   : > { %s352_s18 = sshll.u32 %s719_s17, 3 }
  0x57   : > { %v217_v9 = vpack.c.bf16 %v216_v8, %v215_v7  ;;  %s206_s25 = scalar_lea.vmem %s701_s3, %s352_s18 }
  0x5a   : > { %365 = vmatmul.mubr.bf16.vlgmr.msra.gmra.mrb[0].mxu0 %v217_v9 }
 0x12d   : > { %v253_v10 = vpop.f32.mrb[0].mxu0 }
 0x12e   : > { %261 = vst.msk [vmem:[%s206_s25] sm:$0xff] %vm260_vm1, %v253_v10  ;;  %v366_v11 = vpop.f32.mrb[1].mxu0 }
 0x12f   : > { %v256_v12 = vpop.f32.mrb[2].mxu0 }
 0x130   : > { %262 = vst.msk [vmem:[%s206_s25 + $0x8] sm:$0xff] %vm260_vm1, %v256_v12  ;;  %v367_v13 = vpop.f32.mrb[3].mxu0 }
 0x131 PF: > { %p14_p6 = scmp.ge.s32.totalorder %s597_s23, 4   ;;  %s714_s12 = smov %s512_s13 }
 0x132   : > { %s715_s13 = smov %s516_s14  ;;  %s716_s14 = smov %s623_s11 }
 0x133   : > { %s717_s15 = smov %s597_s23  ;;  %16 = sbr.rel (!%p14_p6) target bundleno = 4 (0x4), region = 76 }
 0x13a   :  { %285 = vsyncpa [#allocation3], 1 }
 0x13b   :  { %287 = vsyncpa [#allocation3 + $0x1], 1 }
 0x13c   :  { %288 = vsyncpa [#allocation5], 1 }

// kernel: tpu_custom_call.1
= control target key start
LH: loop header
LB: loop body
LE: loop exit
PB: predicated region body
PF: predicated region fallthrough
CT: control target
= control target key end

     0   :  { %8 = vsyncpa [#allocation3], 0  ;;  %s698_s0 = inlined_call_operand.hbm [shape: bf16[32,128], index: 0, kind: input, shape index: {}]   ;;  %s699_s1 = inlined_call_operand.hbm [shape: f32[16,128], index: 1, kind: input, shape index: {}]   ;;  %s700_s2 = inlined_call_operand.vmem [shape: bf16[8,128], index: 2, kind: input, shape index: {}]   ;;  %s701_s3 = inlined_call_operand.vmem [shape: f32[32,8], index: 3, kind: output, shape index: {}]  }
   0x1   :  { %10 = vsyncpa [#allocation3 + $0x1], 0 }
   0x2   :  { %11 = vsyncpa [#allocation5], 0  ;;  %s550_s12 = smov 0   ;;  %s552_s13 = smov 0  }
   0x3   :  { %s554_s14 = smov 0   ;;  %s556_s15 = smov 0  }
   0x4 LB: > { %s340_s16 = sadd.s32 4294967295, %s520_s15   ;;  %p37_p0 = scmp.ne.s32.totalorder %s512_s13, %s508_s12  ;;  %s520_s15 = sphi %s556_s15, %s717_s15   ;;  %s516_s14 = sphi %s554_s14, %s716_s14   ;;  %s512_s13 = sphi %s552_s13, %s715_s13   ;;  %s508_s12 = sphi %s550_s12, %s714_s12  }
   0x5   : > { %p572_p1 = scmp.eq.s32.totalorder %s340_s16, 0  ;;  %p342_p2 = scmp.ge.s32.totalorder %s520_s15, 1 }
   0x6   : > { %p116_p3 = scmp.lt.s32.totalorder %s520_s15, 3  ;;  %s522_s20 = smov [#allocation4]  }
   0x7   : > { %s706_s17 = scalar_select %p572_p1, 1, 0 }
   0x8   : > { %p580_p4 = por %p572_p1, %p37_p0  ;;  %p584_p5 = pnand %p342_p2, %p116_p3 }
   0x9   : > { %s128_s21 = sshll.u32 %s522_s20, 4  ;;  %s597_s23 = sadd.s32 1, %s520_s15   ;;  %s129_s21 = int_to_ptr.vmem [resolvable:$true] %s128_s21 }
   0xa   : > { %s707_s18 = scalar_select %p580_p4, 1, 0 }
   0xb   : > { %s708_s19 = scalar_select %p584_p5, 1, 0 }
   0xc   : > { %p374_p6 = pneg %p584_p5  ;;  %s24_s24 = sadd.s32 1, %s516_s14 }
   0xd   : > { %s21_s25 = ssub.s32 %s520_s15, %s597_s23  ;;  %s424_s28 = scalar_lea.hbm %s699_s1, 256 }
   0xe   : > { %p592_p7 = pnand %p374_p6, %p572_p1  ;;  %p425_p8 = scmp.ne.s32.totalorder %s699_s1, %s424_s28 }
   0xf   : > { %p431_p12 = scmp.lt.u32.totalorder %s424_s28, %s699_s1 }
  0x10   : > { %p426_p9 = pneg %p592_p7 }
  0x12   : > { %p427_p10 = pnand %p426_p9, %p425_p8 }
  0x14   : > { %p428_p11 = pneg %p427_p10 }
  0x16   : > { %p433_p13 = pnand %p431_p12, %p428_p11 }
  0x18   : > { %436 = shalt.err (!%p433_p13)
}
  0x19   : > { %s437_s6 = scalar_lea.vmem %s129_s21, 256  ;;  %p445_p6 = scmp.lt.s32.totalorder %s129_s21, %s129_s21 }
  0x1a   : > { %p438_p0 = scmp.ne.s32.totalorder %s129_s21, %s437_s6  ;;  %p446_p1 = scmp.lt.s32.totalorder %s437_s6, %s437_s6 }
  0x1c   : > { %p440_p2 = pnand %p438_p0, %p426_p9  ;;  %p447_p4 = por %p446_p1, %p445_p6 }
  0x1e   : > { %p441_p3 = pneg %p440_p2 }
  0x20   : > { %p448_p5 = pnand %p447_p4, %p441_p3 }
  0x22   : > { %451 = shalt.err (!%p448_p5)
}
  0x23   : > { %s523_s7 = smov 128   ;;  %s524_s8 = smov 8  }
  0x24   : > { %377 = dma.hbm_to_vmem [thread:$0]  (!%p592_p7), %s699_s1, 256, %s129_s21, [#allocation5], %s523_s7, %s523_s7, %s524_s8  }
  0x25   : > { %p22_p8 = scmp.eq.s32.totalorder %s21_s25, 0  ;;  %p31_p9 = scmp.ne.s32.totalorder %s516_s14, %s512_s13 }
  0x26   : > { %p32_p1 = scmp.eq.s32.totalorder %s520_s15, 0  ;;  %p383_p4 = scmp.lt.s32.totalorder %s520_s15, 2 }
  0x27   : > { %s623_s11 = scalar_select %p22_p8, %s516_s14, %s24_s24  }
  0x28   : > { %p33_p5 = por %p32_p1, %p31_p9  ;;  %s145_s12 = sand.u32 1, %s516_s14  }
  0x29   : > { %s345_s20 = sshll.u32 %s145_s12, 3  ;;  %s355_s26 = sshll.u32 %s520_s15, 7 }
  0x2a   : > { %s630_s29 = scalar_lea.hbm %s698_s0, %s355_s26  ;;  %s149_s21 = scalar_lea.vmem [#allocation2], %s345_s20 }
  0x2b   : > { %s156_s22 = sshll.u32 %s149_s21, 4  ;;  %p634_p7 = pnand %p383_p4, %p33_p5  ;;  %s632_s22 = int_to_ptr.vmem [resolvable:$true] %s156_s22 }
  0x2c   : > { %s638_s25 = scalar_lea.sflag [#allocation3], %s145_s12  ;;  %s452_s30 = scalar_lea.hbm %s630_s29, 128 }
  0x2d   : > { %p453_p10 = scmp.ne.s32.totalorder %s630_s29, %s452_s30  ;;  %p454_p11 = pneg %p634_p7 }
  0x2e   : > { %s457_s6 = scalar_lea.hbm %s698_s0, 256  ;;  %p458_p0 = scmp.lt.u32.totalorder %s630_s29, %s698_s0 }
  0x2f   : > { %p455_p12 = pnand %p454_p11, %p453_p10  ;;  %p459_p2 = scmp.lt.u32.totalorder %s457_s6, %s452_s30 }
  0x30   : > { %p461_p6 = scmp.lt.u32.totalorder %s452_s30, %s630_s29 }
  0x31   : > { %p456_p13 = pneg %p455_p12  ;;  %p460_p3 = por %p459_p2, %p458_p0 }
  0x33   : > { %p462_p8 = por %p461_p6, %p460_p3 }
  0x35   : > { %p463_p9 = pnand %p462_p8, %p456_p13 }
  0x37   : > { %466 = shalt.err (!%p463_p9)
}
  0x38   : > { %s467_s9 = scalar_lea.vmem %s632_s22, 128  ;;  %s525_s10 = smov [#allocation2]  }
  0x39   : > { %p468_p1 = scmp.ne.s32.totalorder %s632_s22, %s467_s9  ;;  %s472_s12 = sshll.u32 %s525_s10, 4  ;;  %s473_s12 = int_to_ptr.vmem [resolvable:$false] %s472_s12 }
  0x3a   : > { %s474_s20 = scalar_lea.vmem %s473_s12, 256  ;;  %p475_p10 = scmp.lt.s32.totalorder %s632_s22, %s473_s12 }
  0x3b   : > { %p470_p4 = pnand %p468_p1, %p454_p11  ;;  %p476_p12 = scmp.lt.s32.totalorder %s474_s20, %s467_s9 }
  0x3d   : > { %p471_p5 = pneg %p470_p4  ;;  %p477_p0 = por %p476_p12, %p475_p10 }
  0x3f   : > { %p478_p2 = pnand %p477_p0, %p471_p5 }
  0x41   : > { %481 = shalt.err (!%p478_p2)
}
  0x42   : > { %s526_s26 = smov 64   ;;  %s527_s27 = smov 4  }
  0x43   : > { %381 = dma.hbm_to_vmem [thread:$0]  (!%p634_p7), %s630_s29, 128, %s632_s22, %s638_s25, %s526_s26, %s526_s26, %s527_s27  }
  0x44   : > { %p711_p11 = scmp.ne.s32.totalorder %s708_s19, 0 }
  0x45   : > { %s170_s28 = sand.u32 (!%p711_p11), 1, %s512_s13   ;;  %p712_p13 = scmp.ne.s32.totalorder (!%p711_p11), %s707_s18, 0 }
  0x46   : > { %168 = sbr.rel (%p711_p11) target bundleno = 305 (0x131), region = 32  ;;  %s349_s21 = sshll.u32 (!%p711_p11), %s170_s28, 3 }
  0x47   : > { %s171_s30 = scalar_lea.sflag (!%p711_p11), [#allocation3], %s170_s28  ;;  %s174_s4 = scalar_lea.vmem (!%p711_p11), [#allocation2], %s349_s21 }
  0x4d   : > { %499 = dma.done.wait (%p712_p13), %s171_s30, 128  }
  0x4e   : > { %501 = vsyncadd (%p712_p13), %s171_s30, 4294967168  ;;  %p713_p3 = scmp.ne.s32.totalorder %s706_s17, 0 }
  0x50   : > { %503 = dma.done.wait (%p713_p3), [#allocation5], 256  }
  0x51   : > { %505 = vsyncadd (%p713_p3), [#allocation5], 4294967040  ;;  %v528_v0 = vmov 0.0   ;;  %vm529_vm0 = vmmov 0   ;;  %v218_v1 = vld [vmem:[%s700_s2] sm:$0xf] }
  0x52   : > { %362 = vmatprep.subr.bf16.mxu0 %v528_v0  ;;  %364 = vmatprep.mubr.msk.bf16.mxu0 %vm529_vm0, %v528_v0  ;;  %v357_v2 = vld [vmem:[%s174_s4] sm:$0xff]   ;;  %v213_v3 = vld [vmem:[#allocation4] sm:$0xff]  ;;  %v214_v6 = vld [vmem:[#allocation4 + $0x8] sm:$0xff]  ;;  %s351_s17 = sshll.u32 %s340_s16, 1  ;;  %vm260_vm1 = vcmask 64512  }
  0x53   : > { %363 = vmatpush3.bf16.xpose.msra.mxu0 %v218_v1  ;;  %v358_v4 = vunpack.c.l.bf16 %v357_v2  ;;  %v359_v5 = vunpack.c.h.bf16 %v357_v2  ;;  %p203_p7 = scmp.lt.s32.totalorder %s351_s17, 3 }
  0x55   : > { %v215_v7 = vmul.f32 %v358_v4, %v213_v3  ;;  %v216_v8 = vmul.f32 %v359_v5, %v214_v6  ;;  %s719_s17 = smov (!%p203_p7, %s351_s17), 3 }
  0x56   : > { %s352_s18 = sshll.u32 %s719_s17, 3 }
  0x57   : > { %v217_v9 = vpack.c.bf16 %v216_v8, %v215_v7  ;;  %s206_s25 = scalar_lea.vmem %s701_s3, %s352_s18 }
  0x5a   : > { %365 = vmatmul.mubr.bf16.vlgmr.msra.gmra.mrb[0].mxu0 %v217_v9 }
 0x12d   : > { %v253_v10 = vpop.f32.mrb[0].mxu0 }
 0x12e   : > { %261 = vst.msk [vmem:[%s206_s25] sm:$0xff] %vm260_vm1, %v253_v10  ;;  %v366_v11 = vpop.f32.mrb[1].mxu0 }
 0x12f   : > { %v256_v12 = vpop.f32.mrb[2].mxu0 }
 0x130   : > { %262 = vst.msk [vmem:[%s206_s25 + $0x8] sm:$0xff] %vm260_vm1, %v256_v12  ;;  %v367_v13 = vpop.f32.mrb[3].mxu0 }
 0x131 PF: > { %p14_p6 = scmp.ge.s32.totalorder %s597_s23, 4   ;;  %s714_s12 = smov %s512_s13 }
 0x132   : > { %s715_s13 = smov %s516_s14  ;;  %s716_s14 = smov %s623_s11 }
 0x133   : > { %s717_s15 = smov %s597_s23  ;;  %16 = sbr.rel (!%p14_p6) target bundleno = 4 (0x4), region = 76 }
 0x13a   :  { %285 = vsyncpa [#allocation3], 1 }
 0x13b   :  { %287 = vsyncpa [#allocation3 + $0x1], 1 }
 0x13c   :  { %288 = vsyncpa [#allocation5], 1 }

</bundles_post_ra>
